<compile_context>
chip_gen: v7x
topology: tpu7x:2x2x1
jax: 0.10.0
libtpu: 0.0.40
codegen_flags: <defaults>
</compile_context>

<pallas_src>
import functools

import jax
import jax.numpy as jnp
from jax.experimental import pallas as pl
from jax.experimental.pallas import tpu as pltpu


# ----------------------------- Pallas kernel --------------------------------
def _mlp3_kernel(x_ref, w1_ref, b1_ref, w2_ref, b2_ref, w3_ref, b3_ref, o_ref):
    # x_ref : (tm, D)      w1_ref: (D, H)   b1_ref: (1, H)
    # w2_ref: (H, H)       b2_ref: (1, H)
    # w3_ref: (H, O)       b3_ref: (1, O)   o_ref : (tm, O)
    h = jnp.dot(x_ref[...], w1_ref[...], preferred_element_type=jnp.float32)
    h = jnp.maximum(h + b1_ref[...], 0.0)

    h = jnp.dot(h.astype(w2_ref.dtype), w2_ref[...],
                preferred_element_type=jnp.float32)
    h = jnp.maximum(h + b2_ref[...], 0.0)

    y = jnp.dot(h.astype(w3_ref.dtype), w3_ref[...],
                preferred_element_type=jnp.float32)
    o_ref[...] = (y + b3_ref[...]).astype(o_ref.dtype)


# ----------------------------- Forward wrapper -------------------------------
@functools.partial(jax.jit, static_argnames=("tm", "use_bf16"))
def proximity_regressor_forward(params, x, *, tm=128, use_bf16=False):
    """Forward pass of ProximityRegressor.

    x: (B, input_dim) float32  ->  (B, output_dim) float32
    params hold weights already transposed to (in, out) layout.
    """
    w1, b1 = params["w1"], params["b1"]     # (D, H), (H,)
    w2, b2 = params["w2"], params["b2"]     # (H, H), (H,)
    w3, b3 = params["w3"], params["b3"]     # (H, O), (O,)

    B, D = x.shape
    H1 = w1.shape[1]
    H2 = w2.shape[1]
    O = w3.shape[1]

    if use_bf16:
        # bf16 operands, f32 accumulation (v6e/v7x MXU native path); biases and
        # ReLU stay f32 inside the kernel.
        x_in, w1_in, w2_in, w3_in = (a.astype(jnp.bfloat16) for a in (x, w1, w2, w3))
    else:
        x_in, w1_in, w2_in, w3_in = x, w1, w2, w3

    b1_2d = b1.reshape(1, H1).astype(jnp.float32)
    b2_2d = b2.reshape(1, H2).astype(jnp.float32)
    b3_2d = b3.reshape(1, O).astype(jnp.float32)

    # Row tile: full batch if it fits in one MXU-sized tile, else 128-row tiles
    # with a ragged last block (no padding copy in XLA).
    tm_eff = B if B <= tm else tm
    grid = (pl.cdiv(B, tm_eff),)

    out = pl.pallas_call(
        _mlp3_kernel,
        out_shape=jax.ShapeDtypeStruct((B, O), jnp.float32),
        grid_spec=pltpu.PrefetchScalarGridSpec(
            num_scalar_prefetch=0,
            grid=grid,
            in_specs=[
                pl.BlockSpec((tm_eff, D), lambda i: (i, 0)),   # x row tile
                pl.BlockSpec((D, H1), lambda i: (0, 0)),       # W1 (resident)
                pl.BlockSpec((1, H1), lambda i: (0, 0)),       # b1
                pl.BlockSpec((H1, H2), lambda i: (0, 0)),      # W2 (resident)
                pl.BlockSpec((1, H2), lambda i: (0, 0)),       # b2
                pl.BlockSpec((H2, O), lambda i: (0, 0)),       # W3 (resident)
                pl.BlockSpec((1, O), lambda i: (0, 0)),        # b3
            ],
            out_specs=pl.BlockSpec((tm_eff, O), lambda i: (i, 0)),
        ),
        compiler_params=pltpu.CompilerParams(
            dimension_semantics=("parallel",)),
    )(x_in, w1_in, b1_2d, w2_in, b2_2d, w3_in, b3_2d)

    return out


# ----------------------------- Parameter init --------------------------------
def orthogonal_init(key, out_dim, in_dim, scale=1.0):
    """Deterministic equivalent of nn.init.orthogonal_ on a (out_dim, in_dim) mat."""
    n = max(out_dim, in_dim)
    a = jax.random.normal(key, (n, n), dtype=jnp.float32)
    q, r = jnp.linalg.qr(a)
    q = q * jnp.sign(jnp.diag(r))[None, :]   # sign fix -> unique decomposition
    return scale * q[:out_dim, :in_dim]


def make_proximity_regressor_params(key, input_dim=512, output_dim=2,
                                    init_scale=1.0):
    hidden = input_dim // 2
    k1, k2, k3 = jax.random.split(key, 3)
    # PyTorch Linear weight is (out, in); we store the transpose (in, out) so
    # the kernel computes x @ W directly with no activation transposes.
    w1 = orthogonal_init(k1, hidden, input_dim, init_scale).T     # (D, H)
    w2 = orthogonal_init(k2, hidden, hidden, init_scale).T        # (H, H)
    w3 = orthogonal_init(k3, output_dim, hidden, init_scale).T    # (H, O)
    return {
        "w1": w1, "b1": jnp.zeros((hidden,), jnp.float32),
        "w2": w2, "b2": jnp.zeros((hidden,), jnp.float32),
        "w3": w3, "b3": jnp.zeros((output_dim,), jnp.float32),
    }


# ----------------------------- Reference (pure JAX) ---------------------------
def _reference_forward(params, x):
    h = jnp.maximum(x @ params["w1"] + params["b1"], 0.0)
    h = jnp.maximum(h @ params["w2"] + params["b2"], 0.0)
    return h @ params["w3"] + params["b3"]


if __name__ == "__main__":
    key = jax.random.PRNGKey(0)
    k_param, k_x = jax.random.split(key)

    B = 8
    INPUT_DIM = 512       # module default
    OUTPUT_DIM = 2        # module default

    params = make_proximity_regressor_params(
        k_param, input_dim=INPUT_DIM, output_dim=OUTPUT_DIM, init_scale=1.0)
    x = jax.random.normal(k_x, (B, INPUT_DIM), dtype=jnp.float32)

    out = proximity_regressor_forward(params, x)
    jax.block_until_ready(out)

    assert out.shape == (B, OUTPUT_DIM), out.shape

    ref = _reference_forward(params, x)
    max_err = float(jnp.max(jnp.abs(out - ref)))
    assert max_err < 1e-4, f"max abs err {max_err}"

    print("KERNEL_OK")
</pallas_src>

<mosaic_0001>
module attributes {stable_mosaic.version = 11 : i64} {
  func.func @_mlp3_kernel(%arg0: i32, %arg1: memref<8x512xf32, #tpu.memory_space<vmem>>, %arg2: memref<512x256xf32, #tpu.memory_space<vmem>>, %arg3: memref<1x256xf32, #tpu.memory_space<vmem>>, %arg4: memref<256x256xf32, #tpu.memory_space<vmem>>, %arg5: memref<1x256xf32, #tpu.memory_space<vmem>>, %arg6: memref<256x2xf32, #tpu.memory_space<vmem>>, %arg7: memref<1x2xf32, #tpu.memory_space<vmem>>, %arg8: memref<8x2xf32, #tpu.memory_space<vmem>>) attributes {dimension_semantics = [#tpu.dimension_semantics<parallel>], iteration_bounds = array<i64: 1>, scalar_prefetch = 0 : i64, scratch_operands = 0 : i64, tpu.core_type = #tpu.core_type<tc>, window_params = [{transform_indices = @transform_0, window_bounds = array<i64: 8, 512>}, {pipeline_mode = #tpu.pipeline_mode<synchronous>, transform_indices = @transform_1, window_bounds = array<i64: 512, 256>}, {pipeline_mode = #tpu.pipeline_mode<synchronous>, transform_indices = @transform_2, window_bounds = array<i64: 1, 256>}, {pipeline_mode = #tpu.pipeline_mode<synchronous>, transform_indices = @transform_3, window_bounds = array<i64: 256, 256>}, {pipeline_mode = #tpu.pipeline_mode<synchronous>, transform_indices = @transform_4, window_bounds = array<i64: 1, 256>}, {pipeline_mode = #tpu.pipeline_mode<synchronous>, transform_indices = @transform_5, window_bounds = array<i64: 256, 2>}, {pipeline_mode = #tpu.pipeline_mode<synchronous>, transform_indices = @transform_6, window_bounds = array<i64: 1, 2>}, {transform_indices = @transform_7, window_bounds = array<i64: 8, 2>}]} {
    %c0 = arith.constant 0 : index
    %c0_0 = arith.constant 0 : index
    %0 = vector.load %arg1[%c0, %c0_0] : memref<8x512xf32, #tpu.memory_space<vmem>>, vector<8x512xf32>
    %c0_1 = arith.constant 0 : index
    %c0_2 = arith.constant 0 : index
    %1 = vector.load %arg2[%c0_1, %c0_2] : memref<512x256xf32, #tpu.memory_space<vmem>>, vector<512x256xf32>
    %cst = arith.constant dense<0.000000e+00> : vector<8x256xf32>
    %2 = tpu.matmul %0, %1, %cst {dimension_numbers = #tpu.dot_dimension_numbers<[1], [0], [0], [1], [0, 0, 1, 1], [], []>} : vector<8x512xf32>, vector<512x256xf32>, vector<8x256xf32> -> vector<8x256xf32>
    %c0_3 = arith.constant 0 : index
    %c0_4 = arith.constant 0 : index
    %3 = vector.load %arg3[%c0_3, %c0_4] : memref<1x256xf32, #tpu.memory_space<vmem>>, vector<1x256xf32>
    %4 = vector.broadcast %3 : vector<1x256xf32> to vector<8x256xf32>
    %5 = arith.addf %2, %4 : vector<8x256xf32>
    %cst_5 = arith.constant 0.000000e+00 : f32
    %6 = vector.broadcast %cst_5 : f32 to vector<8x256xf32>
    %7 = arith.maximumf %5, %6 : vector<8x256xf32>
    %c0_6 = arith.constant 0 : index
    %c0_7 = arith.constant 0 : index
    %8 = vector.load %arg4[%c0_6, %c0_7] : memref<256x256xf32, #tpu.memory_space<vmem>>, vector<256x256xf32>
    %cst_8 = arith.constant dense<0.000000e+00> : vector<8x256xf32>
    %9 = tpu.matmul %7, %8, %cst_8 {dimension_numbers = #tpu.dot_dimension_numbers<[1], [0], [0], [1], [0, 0, 1, 1], [], []>} : vector<8x256xf32>, vector<256x256xf32>, vector<8x256xf32> -> vector<8x256xf32>
    %c0_9 = arith.constant 0 : index
    %c0_10 = arith.constant 0 : index
    %10 = vector.load %arg5[%c0_9, %c0_10] : memref<1x256xf32, #tpu.memory_space<vmem>>, vector<1x256xf32>
    %11 = vector.broadcast %10 : vector<1x256xf32> to vector<8x256xf32>
    %12 = arith.addf %9, %11 : vector<8x256xf32>
    %cst_11 = arith.constant 0.000000e+00 : f32
    %13 = vector.broadcast %cst_11 : f32 to vector<8x256xf32>
    %14 = arith.maximumf %12, %13 : vector<8x256xf32>
    %c0_12 = arith.constant 0 : index
    %c0_13 = arith.constant 0 : index
    %15 = vector.load %arg6[%c0_12, %c0_13] : memref<256x2xf32, #tpu.memory_space<vmem>>, vector<256x2xf32>
    %cst_14 = arith.constant dense<0.000000e+00> : vector<8x2xf32>
    %16 = tpu.matmul %14, %15, %cst_14 {dimension_numbers = #tpu.dot_dimension_numbers<[1], [0], [0], [1], [0, 0, 1, 1], [], []>} : vector<8x256xf32>, vector<256x2xf32>, vector<8x2xf32> -> vector<8x2xf32>
    %c0_15 = arith.constant 0 : index
    %c0_16 = arith.constant 0 : index
    %17 = vector.load %arg7[%c0_15, %c0_16] : memref<1x2xf32, #tpu.memory_space<vmem>>, vector<1x2xf32>
    %18 = vector.broadcast %17 : vector<1x2xf32> to vector<8x2xf32>
    %19 = arith.addf %16, %18 : vector<8x2xf32>
    %c0_17 = arith.constant 0 : index
    %c0_18 = arith.constant 0 : index
    %20 = vector.load %arg8[%c0_17, %c0_18] : memref<8x2xf32, #tpu.memory_space<vmem>>, vector<8x2xf32>
    tpu.vector_store %arg8[%c0_17, %c0_18], %19 {strides = array<i32>} : memref<8x2xf32, #tpu.memory_space<vmem>>, vector<8x2xf32>,
    return
  }
  func.func @transform_0(%arg0: i32) -> (i32, i32) {
    %c0_i32 = arith.constant 0 : i32
    %c0_i32_0 = arith.constant 0 : i32
    return %arg0, %c0_i32 : i32, i32
  }
  func.func @transform_1(%arg0: i32) -> (i32, i32) {
    %c0_i32 = arith.constant 0 : i32
    %c0_i32_0 = arith.constant 0 : i32
    %c0_i32_1 = arith.constant 0 : i32
    return %c0_i32, %c0_i32_0 : i32, i32
  }
  func.func @transform_2(%arg0: i32) -> (i32, i32) {
    %c0_i32 = arith.constant 0 : i32
    %c0_i32_0 = arith.constant 0 : i32
    %c0_i32_1 = arith.constant 0 : i32
    return %c0_i32, %c0_i32_0 : i32, i32
  }
  func.func @transform_3(%arg0: i32) -> (i32, i32) {
    %c0_i32 = arith.constant 0 : i32
    %c0_i32_0 = arith.constant 0 : i32
    %c0_i32_1 = arith.constant 0 : i32
    return %c0_i32, %c0_i32_0 : i32, i32
  }
  func.func @transform_4(%arg0: i32) -> (i32, i32) {
    %c0_i32 = arith.constant 0 : i32
    %c0_i32_0 = arith.constant 0 : i32
    %c0_i32_1 = arith.constant 0 : i32
    return %c0_i32, %c0_i32_0 : i32, i32
  }
  func.func @transform_5(%arg0: i32) -> (i32, i32) {
    %c0_i32 = arith.constant 0 : i32
    %c0_i32_0 = arith.constant 0 : i32
    %c0_i32_1 = arith.constant 0 : i32
    return %c0_i32, %c0_i32_0 : i32, i32
  }
  func.func @transform_6(%arg0: i32) -> (i32, i32) {
    %c0_i32 = arith.constant 0 : i32
    %c0_i32_0 = arith.constant 0 : i32
    %c0_i32_1 = arith.constant 0 : i32
    return %c0_i32, %c0_i32_0 : i32, i32
  }
  func.func @transform_7(%arg0: i32) -> (i32, i32) {
    %c0_i32 = arith.constant 0 : i32
    %c0_i32_0 = arith.constant 0 : i32
    return %arg0, %c0_i32 : i32, i32
  }
}

</mosaic_0001>

<bundles_post_ra>
// kernel: proximity_regressor_forward.1
= control target key start
LH: loop header
LB: loop body
LE: loop exit
PB: predicated region body
PF: predicated region fallthrough
CT: control target
= control target key end

     0   :  { %12 = vsyncpa [#allocation3], 0  ;;  %s1124_s0 = inlined_call_operand.vmem [shape: f32[8,512], index: 0, kind: input, shape index: {}]   ;;  %s1125_s1 = inlined_call_operand.hbm [shape: f32[512,256], index: 1, kind: input, shape index: {}]   ;;  %s1126_s2 = inlined_call_operand.vmem [shape: f32[1,256], index: 2, kind: input, shape index: {}]   ;;  %s1127_s3 = inlined_call_operand.hbm [shape: f32[256,256], index: 3, kind: input, shape index: {}]   ;;  %s1128_s4 = inlined_call_operand.vmem [shape: f32[1,256], index: 4, kind: input, shape index: {}]   ;;  %s1129_s5 = inlined_call_operand.vmem [shape: f32[256,2], index: 5, kind: input, shape index: {}]   ;;  %s1130_s6 = inlined_call_operand.vmem [shape: f32[1,2], index: 6, kind: input, shape index: {}]   ;;  %s1131_s7 = inlined_call_operand.vmem [shape: f32[8,2], index: 7, kind: output, shape index: {}]  }
   0x1   :  { %13 = vsyncpa [#allocation5], 0  ;;  %s924_s24 = smov [#allocation2]   ;;  %s876_s28 = scalar_lea.hbm %s1125_s1, 16384 }
   0x2   :  { %s21_s25 = sshll.u32 %s924_s24, 4  ;;  %p877_p0 = scmp.ne.s32.totalorder %s1125_s1, %s876_s28  ;;  %s22_s25 = int_to_ptr.vmem [resolvable:$true] %s21_s25 }
   0x3   :  { %p880_p1 = scmp.lt.u32.totalorder %s876_s28, %s1125_s1 }
   0x5   :  { %p882_p2 = pnand %p880_p1, %p877_p0 }
   0x7   :  { %885 = shalt.err (!%p882_p2)
}
   0x8   :  { %s886_s10 = scalar_lea.vmem %s22_s25, 16384  ;;  %p891_p4 = scmp.lt.s32.totalorder %s22_s25, %s22_s25 }
   0x9   :  { %p887_p3 = scmp.ne.s32.totalorder %s22_s25, %s886_s10  ;;  %p892_p5 = scmp.lt.s32.totalorder %s886_s10, %s886_s10 }
   0xb   :  { %p893_p6 = por %p892_p5, %p891_p4 }
   0xd   :  { %p894_p7 = pnand %p893_p6, %p887_p3 }
   0xf   :  { %897 = shalt.err (!%p894_p7)
}
  0x10   :  { %s925_s11 = smov 256   ;;  %s926_s12 = smov 16  }
  0x11   :  { %27 = dma.hbm_to_vmem [thread:$0]  %s1125_s1, 16384, %s22_s25, [#allocation3], %s925_s11, %s925_s11, %s926_s12  }
  0x12   :  { %s927_s15 = smov [#allocation4]   ;;  %s898_s19 = scalar_lea.hbm %s1127_s3, 8192 }
  0x13   :  { %s35_s16 = sshll.u32 %s927_s15, 4  ;;  %p899_p8 = scmp.ne.s32.totalorder %s1127_s3, %s898_s19  ;;  %s36_s16 = int_to_ptr.vmem [resolvable:$true] %s35_s16 }
  0x14   :  { %p902_p9 = scmp.lt.u32.totalorder %s898_s19, %s1127_s3 }
  0x16   :  { %p904_p10 = pnand %p902_p9, %p899_p8 }
  0x18   :  { %907 = shalt.err (!%p904_p10)
}
  0x19   :  { %s908_s24 = scalar_lea.vmem %s36_s16, 8192  ;;  %p913_p12 = scmp.lt.s32.totalorder %s36_s16, %s36_s16 }
  0x1a   :  { %p909_p11 = scmp.ne.s32.totalorder %s36_s16, %s908_s24  ;;  %p914_p13 = scmp.lt.s32.totalorder %s908_s24, %s908_s24 }
  0x1c   :  { %p915_p0 = por %p914_p13, %p913_p12 }
  0x1e   :  { %p916_p1 = pnand %p915_p0, %p909_p11 }
  0x20   :  { %919 = shalt.err (!%p916_p1)
}
  0x21   :  { %41 = dma.hbm_to_vmem [thread:$0]  %s1127_s3, 8192, %s36_s16, [#allocation5], %s925_s11, %s925_s11, %s926_s12  }
  0x22   :  { %920 = dma.done.wait [#allocation3], 16384  }
  0x23   :  { %921 = vsyncadd [#allocation3], 4294950912 }
  0x24   :  { %922 = dma.done.wait [#allocation5], 8192  }
  0x25   :  { %923 = vsyncadd [#allocation5], 4294959104  ;;  %v59_v0 = vld [vmem:[#allocation2 + $0x8] sm:$0xff]  ;;  %v61_v1 = vld [vmem:[#allocation2 + $0x18] sm:$0xff]  ;;  %vm600_vm0 = vcmask 15360  }
  0x26   :  { %v58_v2 = vld [vmem:[#allocation2] sm:$0xff]  ;;  %v644_v3 = vpack.c.bf16 %v61_v1, %v59_v0  ;;  %v60_v4 = vld [vmem:[#allocation2 + $0x10] sm:$0xff]  ;;  %v63_v5 = vld [vmem:[#allocation2 + $0x28] sm:$0xff] }
  0x27   :  { %v65_v6 = vld [vmem:[#allocation2 + $0x38] sm:$0xff]  ;;  %v646_v7 = vpack.c.bf16 %v60_v4, %v58_v2  ;;  %v62_v9 = vld [vmem:[#allocation2 + $0x20] sm:$0xff]  ;;  %v64_v10 = vld [vmem:[#allocation2 + $0x30] sm:$0xff] }
  0x28   :  { %v648_v8 = vpack.c.bf16 %v65_v6, %v63_v5  ;;  %v67_v11 = vld [vmem:[#allocation2 + $0x48] sm:$0xff]  ;;  %645 = vmatprep.subr.bf16.mxu0 %v644_v3  ;;  %v69_v12 = vld [vmem:[#allocation2 + $0x58] sm:$0xff]  ;;  %v650_v13 = vpack.c.bf16 %v64_v10, %v62_v9  ;;  %v66_v15 = vld [vmem:[#allocation2 + $0x40] sm:$0xff] }
  0x29   :  { %647 = vmatpush1.bf16.msra.mxu0 %v646_v7  ;;  %v652_v14 = vpack.c.bf16 %v69_v12, %v67_v11  ;;  %v68_v16 = vld [vmem:[#allocation2 + $0x50] sm:$0xff]  ;;  %v71_v17 = vld [vmem:[#allocation2 + $0x68] sm:$0xff]  ;;  %v73_v18 = vld [vmem:[#allocation2 + $0x78] sm:$0xff] }
  0x2a   :  { %649 = vmatprep.subr.bf16.mxu0 %v648_v8  ;;  %v654_v19 = vpack.c.bf16 %v68_v16, %v66_v15  ;;  %v656_v20 = vpack.c.bf16 %v73_v18, %v71_v17  ;;  %v70_v21 = vld [vmem:[#allocation2 + $0x60] sm:$0xff]  ;;  %v72_v22 = vld [vmem:[#allocation2 + $0x70] sm:$0xff]  ;;  %v75_v23 = vld [vmem:[#allocation2 + $0x88] sm:$0xff] }
  0x2b   :  { %v77_v24 = vld [vmem:[#allocation2 + $0x98] sm:$0xff]  ;;  %v658_v25 = vpack.c.bf16 %v72_v22, %v70_v21  ;;  %v74_v27 = vld [vmem:[#allocation2 + $0x80] sm:$0xff]  ;;  %v76_v28 = vld [vmem:[#allocation2 + $0x90] sm:$0xff] }
  0x2c   :  { %v660_v26 = vpack.c.bf16 %v77_v24, %v75_v23  ;;  %v79_v29 = vld [vmem:[#allocation2 + $0xa8] sm:$0xff]  ;;  %v81_v30 = vld [vmem:[#allocation2 + $0xb8] sm:$0xff]  ;;  %v662_v31 = vpack.c.bf16 %v76_v28, %v74_v27  ;;  %v78_v33 = vld [vmem:[#allocation2 + $0xa0] sm:$0xff] }
  0x2d   :  { %651 = vmatpush1.bf16.msra.mxu0 %v650_v13  ;;  %v664_v32 = vpack.c.bf16 %v81_v30, %v79_v29  ;;  %v80_v34 = vld [vmem:[#allocation2 + $0xb0] sm:$0xff]  ;;  %v83_v35 = vld [vmem:[#allocation2 + $0xc8] sm:$0xff]  ;;  %v85_v36 = vld [vmem:[#allocation2 + $0xd8] sm:$0xff] }
  0x2e   :  { %653 = vmatprep.subr.bf16.mxu0 %v652_v14  ;;  %v666_v37 = vpack.c.bf16 %v80_v34, %v78_v33  ;;  %v668_v38 = vpack.c.bf16 %v85_v36, %v83_v35  ;;  %v82_v39 = vld [vmem:[#allocation2 + $0xc0] sm:$0xff]  ;;  %v84_v40 = vld [vmem:[#allocation2 + $0xd0] sm:$0xff]  ;;  %v55_v41 = vld [vmem:[%s1124_s0 + $0x8] sm:$0xff] }
  0x2f   :  { %v87_v42 = vld [vmem:[#allocation2 + $0xe8] sm:$0xff]  ;;  %v89_v43 = vld [vmem:[#allocation2 + $0xf8] sm:$0xff]  ;;  %262 = vmatprep.mubr.f32.mxu0 %v55_v41  ;;  %v670_v44 = vpack.c.bf16 %v84_v40, %v82_v39  ;;  %v86_v46 = vld [vmem:[#allocation2 + $0xe0] sm:$0xff] }
  0x30   :  { %v672_v45 = vpack.c.bf16 %v89_v43, %v87_v42  ;;  %v88_v47 = vld [vmem:[#allocation2 + $0xf0] sm:$0xff]  ;;  %v91_v48 = vld [vmem:[#allocation2 + $0x108] sm:$0xff]  ;;  %v93_v49 = vld [vmem:[#allocation2 + $0x118] sm:$0xff] }
  0x31   :  { %655 = vmatpush1.bf16.msra.mxu0 %v654_v19  ;;  %v674_v50 = vpack.c.bf16 %v88_v47, %v86_v46  ;;  %v676_v51 = vpack.c.bf16 %v93_v49, %v91_v48  ;;  %v90_v52 = vld [vmem:[#allocation2 + $0x100] sm:$0xff]  ;;  %v92_v53 = vld [vmem:[#allocation2 + $0x110] sm:$0xff]  ;;  %v95_v54 = vld [vmem:[#allocation2 + $0x128] sm:$0xff] }
  0x32   :  { %657 = vmatprep.subr.bf16.mxu0 %v656_v20  ;;  %v97_v55 = vld [vmem:[#allocation2 + $0x138] sm:$0xff]  ;;  %v678_v56 = vpack.c.bf16 %v92_v53, %v90_v52  ;;  %v94_v58 = vld [vmem:[#allocation2 + $0x120] sm:$0xff]  ;;  %v96_v59 = vld [vmem:[#allocation2 + $0x130] sm:$0xff] }
  0x33   :  { %v680_v57 = vpack.c.bf16 %v97_v55, %v95_v54  ;;  %v99_v60 = vld [vmem:[#allocation2 + $0x148] sm:$0xff]  ;;  %v101_v61 = vld [vmem:[#allocation2 + $0x158] sm:$0xff]  ;;  %v682_v62 = vpack.c.bf16 %v96_v59, %v94_v58  ;;  %v98_v0 = vld [vmem:[#allocation2 + $0x140] sm:$0xff] }
  0x34   :  { %v684_v63 = vpack.c.bf16 %v101_v61, %v99_v60  ;;  %v100_v1 = vld [vmem:[#allocation2 + $0x150] sm:$0xff]  ;;  %v103_v2 = vld [vmem:[#allocation2 + $0x168] sm:$0xff]  ;;  %v105_v3 = vld [vmem:[#allocation2 + $0x178] sm:$0xff] }
  0x35   :  { %659 = vmatpush1.bf16.msra.mxu0 %v658_v25  ;;  %v686_v4 = vpack.c.bf16 %v100_v1, %v98_v0  ;;  %v688_v5 = vpack.c.bf16 %v105_v3, %v103_v2  ;;  %v102_v6 = vld [vmem:[#allocation2 + $0x160] sm:$0xff]  ;;  %v104_v7 = vld [vmem:[#allocation2 + $0x170] sm:$0xff]  ;;  %v107_v8 = vld [vmem:[#allocation2 + $0x188] sm:$0xff] }
  0x36   :  { %661 = vmatprep.subr.bf16.mxu0 %v660_v26  ;;  %v109_v9 = vld [vmem:[#allocation2 + $0x198] sm:$0xff]  ;;  %v106_v10 = vld [vmem:[#allocation2 + $0x180] sm:$0xff]  ;;  %v108_v11 = vld [vmem:[#allocation2 + $0x190] sm:$0xff]  ;;  %v690_v12 = vpack.c.bf16 %v104_v7, %v102_v6 }
  0x37   :  { %v111_v13 = vld [vmem:[#allocation2 + $0x1a8] sm:$0xff]  ;;  %v113_v14 = vld [vmem:[#allocation2 + $0x1b8] sm:$0xff]  ;;  %v342_v17 = vld [vmem:[#allocation4] sm:$0xff]  ;;  %v692_v18 = vpack.c.bf16 %v109_v9, %v107_v8  ;;  %v694_v29 = vpack.c.bf16 %v108_v11, %v106_v10 }
  0x38   :  { %v343_v15 = vld [vmem:[#allocation4 + $0x8] sm:$0xff]  ;;  %v345_v16 = vld [vmem:[#allocation4 + $0x18] sm:$0xff]  ;;  %v344_v20 = vld [vmem:[#allocation4 + $0x10] sm:$0xff]  ;;  %v696_v33 = vpack.c.bf16 %v113_v14, %v111_v13 }
  0x39   :  { %663 = vmatpush1.bf16.msra.mxu0 %v662_v31  ;;  %v772_v19 = vpack.c.bf16 %v345_v16, %v343_v15  ;;  %v347_v21 = vld [vmem:[#allocation4 + $0x28] sm:$0xff]  ;;  %v349_v22 = vld [vmem:[#allocation4 + $0x38] sm:$0xff]  ;;  %v774_v23 = vpack.c.bf16 %v344_v20, %v342_v17  ;;  %v346_v25 = vld [vmem:[#allocation4 + $0x20] sm:$0xff] }
  0x3a   :  { %665 = vmatprep.subr.bf16.mxu0 %v664_v32  ;;  %v776_v24 = vpack.c.bf16 %v349_v22, %v347_v21  ;;  %v348_v26 = vld [vmem:[#allocation4 + $0x30] sm:$0xff]  ;;  %v351_v27 = vld [vmem:[#allocation4 + $0x48] sm:$0xff]  ;;  %v353_v28 = vld [vmem:[#allocation4 + $0x58] sm:$0xff] }
  0x3b   :  { %773 = vmatprep.subr.bf16.mxu1 %v772_v19  ;;  %v110_v30 = vld [vmem:[#allocation2 + $0x1a0] sm:$0xff]  ;;  %v112_v31 = vld [vmem:[#allocation2 + $0x1b0] sm:$0xff]  ;;  %v778_v32 = vpack.c.bf16 %v348_v26, %v346_v25  ;;  %v115_v34 = vld [vmem:[#allocation2 + $0x1c8] sm:$0xff]  ;;  %v780_v35 = vpack.c.bf16 %v353_v28, %v351_v27 }
  0x3c   :  { %775 = vmatpush1.bf16.msra.mxu1 %v774_v23  ;;  %v350_v36 = vld [vmem:[#allocation4 + $0x40] sm:$0xff]  ;;  %v355_v39 = vld [vmem:[#allocation4 + $0x68] sm:$0xff]  ;;  %v357_v40 = vld [vmem:[#allocation4 + $0x78] sm:$0xff]  ;;  %v698_v41 = vpack.c.bf16 %v112_v31, %v110_v30 }
  0x3d   :  { %667 = vmatpush1.bf16.msra.mxu0 %v666_v37  ;;  %777 = vmatprep.subr.bf16.mxu1 %v776_v24  ;;  %v352_v37 = vld [vmem:[#allocation4 + $0x50] sm:$0xff]  ;;  %v114_v42 = vld [vmem:[#allocation2 + $0x1c0] sm:$0xff]  ;;  %v119_v46 = vld [vmem:[#allocation2 + $0x1e8] sm:$0xff]  ;;  %v784_v47 = vpack.c.bf16 %v357_v40, %v355_v39 }
  0x3e   :  { %669 = vmatprep.subr.bf16.mxu0 %v668_v38  ;;  %v117_v38 = vld [vmem:[#allocation2 + $0x1d8] sm:$0xff]  ;;  %v116_v43 = vld [vmem:[#allocation2 + $0x1d0] sm:$0xff]  ;;  %v354_v48 = vld [vmem:[#allocation4 + $0x60] sm:$0xff] }
  0x3f   :  { %v356_v49 = vld [vmem:[#allocation4 + $0x70] sm:$0xff]  ;;  %v361_v52 = vld [vmem:[#allocation4 + $0x98] sm:$0xff]  ;;  %v702_v53 = vpack.c.bf16 %v116_v43, %v114_v42  ;;  %v118_v54 = vld [vmem:[#allocation2 + $0x1e0] sm:$0xff] }
  0x40   :  { %779 = vmatpush1.bf16.msra.mxu1 %v778_v32  ;;  %v120_v55 = vld [vmem:[#allocation2 + $0x1f0] sm:$0xff]  ;;  %v123_v58 = vld [vmem:[#allocation2 + $0x208] sm:$0xff]  ;;  %v358_v60 = vld [vmem:[#allocation4 + $0x80] sm:$0xff] }
  0x41   :  { %671 = vmatpush1.bf16.msra.mxu0 %v670_v44  ;;  %v782_v44 = vpack.c.bf16 %v352_v37, %v350_v36  ;;  %781 = vmatprep.subr.bf16.mxu1 %v780_v35  ;;  %v360_v61 = vld [vmem:[#allocation4 + $0x90] sm:$0xff]  ;;  %v365_v0 = vld [vmem:[#allocation4 + $0xb8] sm:$0xff]  ;;  %v706_v1 = vpack.c.bf16 %v120_v55, %v118_v54  ;;  %v127_v6 = vld [vmem:[#allocation2 + $0x228] sm:$0xff] }
  0x42   :  { %673 = vmatprep.subr.bf16.mxu0 %v672_v45  ;;  %v700_v45 = vpack.c.bf16 %v117_v38, %v115_v34  ;;  %v790_v2 = vpack.c.bf16 %v360_v61, %v358_v60  ;;  %v129_v8 = vld [vmem:[#allocation2 + $0x238] sm:$0xff]  ;;  %v362_v9 = vld [vmem:[#allocation4 + $0xa0] sm:$0xff]  ;;  %v364_v10 = vld [vmem:[#allocation4 + $0xb0] sm:$0xff] }
  0x43   :  { %v367_v11 = vld [vmem:[#allocation4 + $0xc8] sm:$0xff]  ;;  %v54_v13 = vld [vmem:[%s1124_s0] sm:$0xff]  ;;  %v712_v16 = vpack.c.bf16 %v129_v8, %v127_v6  ;;  %v128_v17 = vld [vmem:[#allocation2 + $0x230] sm:$0xff]  ;;  %v794_v20 = vpack.c.bf16 %v364_v10, %v362_v9 }
  0x44   :  { %783 = vmatpush1.bf16.msra.mxu1 %v782_v44  ;;  %v126_v15 = vld [vmem:[#allocation2 + $0x220] sm:$0xff]  ;;  %v57_v19 = vld [vmem:[%s1124_s0 + $0x18] sm:$0xff]  ;;  %v368_v24 = vld [vmem:[#allocation4 + $0xd0] sm:$0xff] }
  0x45   :  { %675 = vmatpush1.bf16.msra.mxu0 %v674_v50  ;;  %v121_v50 = vld [vmem:[#allocation2 + $0x1f8] sm:$0xff]  ;;  %785 = vmatprep.subr.bf16.mxu1 %v784_v47  ;;  %v366_v23 = vld [vmem:[#allocation4 + $0xc0] sm:$0xff]  ;;  %v371_v25 = vld [vmem:[#allocation4 + $0xe8] sm:$0xff]  ;;  %v714_v27 = vpack.c.bf16 %v128_v17, %v126_v15 }
  0x46   :  { %677 = vmatprep.subr.bf16.mxu0 %v676_v51  ;;  %v359_v51 = vld [vmem:[#allocation4 + $0x88] sm:$0xff]  ;;  %v133_v21 = vld [vmem:[#allocation2 + $0x258] sm:$0xff]  ;;  %v132_v30 = vld [vmem:[#allocation2 + $0x250] sm:$0xff]  ;;  %v798_v32 = vpack.c.bf16 %v368_v24, %v366_v23 }
  0x47   :  { %v788_v59 = vpack.c.bf16 %v361_v52, %v359_v51  ;;  %v373_v26 = vld [vmem:[#allocation4 + $0xf8] sm:$0xff]  ;;  %v135_v31 = vld [vmem:[#allocation2 + $0x268] sm:$0xff]  ;;  %v370_v35 = vld [vmem:[#allocation4 + $0xe0] sm:$0xff] }
  0x48   :  { %v800_v34 = vpack.c.bf16 %v373_v26, %v371_v25  ;;  %v372_v36 = vld [vmem:[#allocation4 + $0xf0] sm:$0xff]  ;;  %v375_v37 = vld [vmem:[#allocation4 + $0x108] sm:$0xff]  ;;  %v377_v38 = vld [vmem:[#allocation4 + $0x118] sm:$0xff] }
  0x49   :  { %679 = vmatpush1.bf16.msra.mxu0 %v678_v56  ;;  %v786_v56 = vpack.c.bf16 %v356_v49, %v354_v48  ;;  %v136_v42 = vld [vmem:[#allocation2 + $0x270] sm:$0xff]  ;;  %v139_v43 = vld [vmem:[#allocation2 + $0x288] sm:$0xff]  ;;  %v802_v44 = vpack.c.bf16 %v372_v36, %v370_v35  ;;  %v374_v47 = vld [vmem:[#allocation4 + $0x100] sm:$0xff] }
  0x4a   :  { %681 = vmatprep.subr.bf16.mxu0 %v680_v57  ;;  %v704_v57 = vpack.c.bf16 %v121_v50, %v119_v46  ;;  %v804_v46 = vpack.c.bf16 %v377_v38, %v375_v37  ;;  %v376_v48 = vld [vmem:[#allocation4 + $0x110] sm:$0xff]  ;;  %v379_v49 = vld [vmem:[#allocation4 + $0x128] sm:$0xff]  ;;  %v381_v50 = vld [vmem:[#allocation4 + $0x138] sm:$0xff] }
  0x4b   :  { %787 = vmatpush1.bf16.msra.mxu1 %v786_v56  ;;  %v140_v54 = vld [vmem:[#allocation2 + $0x290] sm:$0xff]  ;;  %v143_v55 = vld [vmem:[#allocation2 + $0x2a8] sm:$0xff]  ;;  %v806_v56 = vpack.c.bf16 %v376_v48, %v374_v47  ;;  %v389_v10 = vld [vmem:[#allocation4 + $0x178] sm:$0xff] }
  0x4c   :  { %789 = vmatprep.subr.bf16.mxu1 %v788_v59  ;;  %v378_v59 = vld [vmem:[#allocation4 + $0x120] sm:$0xff]  ;;  %v380_v60 = vld [vmem:[#allocation4 + $0x130] sm:$0xff]  ;;  %v383_v61 = vld [vmem:[#allocation4 + $0x148] sm:$0xff] }
  0x4d   :  { %683 = vmatpush1.bf16.msra.mxu0 %v682_v62  ;;  %v125_v62 = vld [vmem:[#allocation2 + $0x218] sm:$0xff]  ;;  %v384_v8 = vld [vmem:[#allocation4 + $0x150] sm:$0xff]  ;;  %v387_v9 = vld [vmem:[#allocation4 + $0x168] sm:$0xff] }
  0x4e   :  { %685 = vmatprep.subr.bf16.mxu0 %v684_v63  ;;  %v363_v63 = vld [vmem:[#allocation4 + $0xa8] sm:$0xff]  ;;  %v708_v3 = vpack.c.bf16 %v125_v62, %v123_v58  ;;  %v808_v58 = vpack.c.bf16 %v381_v50, %v379_v49  ;;  %v385_v62 = vld [vmem:[#allocation4 + $0x158] sm:$0xff]  ;;  %v150_v25 = vld [vmem:[#allocation2 + $0x2e0] sm:$0xff] }
  0x4f   :  { %v792_v7 = vpack.c.bf16 %v365_v0, %v363_v63  ;;  %791 = vmatpush1.bf16.msra.mxu1 %v790_v2  ;;  %v144_v2 = vld [vmem:[#allocation2 + $0x2b0] sm:$0xff]  ;;  %v812_v6 = vpack.c.bf16 %v385_v62, %v383_v61  ;;  %v151_v15 = vld [vmem:[#allocation2 + $0x2e8] sm:$0xff]  ;;  %v153_v17 = vld [vmem:[#allocation2 + $0x2f8] sm:$0xff] }
  0x50   :  { %v736_v24 = vpack.c.bf16 %v153_v17, %v151_v15  ;;  %v152_v26 = vld [vmem:[#allocation2 + $0x2f0] sm:$0xff]  ;;  %v154_v37 = vld [vmem:[#allocation2 + $0x300] sm:$0xff] }
  0x51   :  { %687 = vmatpush1.bf16.msra.mxu0 %v686_v4  ;;  %v122_v4 = vld [vmem:[#allocation2 + $0x200] sm:$0xff]  ;;  %793 = vmatprep.subr.bf16.mxu1 %v792_v7  ;;  %v738_v35 = vpack.c.bf16 %v152_v26, %v150_v25  ;;  %v156_v38 = vld [vmem:[#allocation2 + $0x310] sm:$0xff] }
  0x52   :  { %689 = vmatprep.subr.bf16.mxu0 %v688_v5  ;;  %v124_v5 = vld [vmem:[#allocation2 + $0x210] sm:$0xff]  ;;  %v382_v7 = vld [vmem:[#allocation4 + $0x140] sm:$0xff]  ;;  %v742_v47 = vpack.c.bf16 %v156_v38, %v154_v37  ;;  %v508_v37 = vld [vmem:[%s1129_s5 + $0x88] sm:$0xff] }
  0x53   :  { %v710_v14 = vpack.c.bf16 %v124_v5, %v122_v4  ;;  %795 = vmatpush1.bf16.msra.mxu1 %v794_v20  ;;  %v810_v4 = vpack.c.bf16 %v380_v60, %v378_v59  ;;  %v149_v5 = vld [vmem:[#allocation2 + $0x2d8] sm:$0xff]  ;;  %v388_v20 = vld [vmem:[#allocation4 + $0x170] sm:$0xff]  ;;  %v158_v49 = vld [vmem:[#allocation2 + $0x320] sm:$0xff] }
  0x54   :  { %v160_v50 = vld [vmem:[#allocation2 + $0x330] sm:$0xff]  ;;  %v167_v59 = vld [vmem:[#allocation2 + $0x368] sm:$0xff]  ;;  %v169_v60 = vld [vmem:[#allocation2 + $0x378] sm:$0xff] }
  0x55   :  { %691 = vmatpush1.bf16.msra.mxu0 %v690_v12  ;;  %v369_v12 = vld [vmem:[#allocation4 + $0xd8] sm:$0xff]  ;;  %v752_v62 = vpack.c.bf16 %v169_v60, %v167_v59  ;;  %v178_v17 = vld [vmem:[#allocation2 + $0x3c0] sm:$0xff]  ;;  %v56_v26 = vld [vmem:[%s1124_s0 + $0x10] sm:$0xff] }
  0x56   :  { %693 = vmatprep.subr.bf16.mxu0 %v692_v18  ;;  %v131_v18 = vld [vmem:[#allocation2 + $0x248] sm:$0xff]  ;;  %v796_v22 = vpack.c.bf16 %v369_v12, %v367_v11  ;;  %v494_v59 = vld [vmem:[%s1129_s5 + $0x18] sm:$0xff]  ;;  %v511_v60 = vld [vmem:[%s1129_s5 + $0xa0] sm:$0xff] }
  0x57   :  { %v716_v28 = vpack.c.bf16 %v133_v21, %v131_v18  ;;  %v816_v18 = vpack.c.bf16 %v389_v10, %v387_v9  ;;  %v391_v21 = vld [vmem:[#allocation4 + $0x188] sm:$0xff] }
  0x58   :  { %797 = vmatprep.subr.bf16.mxu1 %v796_v22  ;;  %v393_v22 = vld [vmem:[#allocation4 + $0x198] sm:$0xff] }
  0x59   :  { %695 = vmatpush1.bf16.msra.mxu0 %v694_v29  ;;  %v130_v29 = vld [vmem:[#allocation2 + $0x240] sm:$0xff]  ;;  %799 = vmatpush1.bf16.msra.mxu1 %v798_v32  ;;  %v392_v32 = vld [vmem:[#allocation4 + $0x190] sm:$0xff] }
  0x5a   :  { %697 = vmatprep.subr.bf16.mxu0 %v696_v33  ;;  %v137_v33 = vld [vmem:[#allocation2 + $0x278] sm:$0xff]  ;;  %v718_v39 = vpack.c.bf16 %v132_v30, %v130_v29  ;;  %801 = vmatprep.subr.bf16.mxu1 %v800_v34  ;;  %v820_v30 = vpack.c.bf16 %v393_v22, %v391_v21 }
  0x5b   :  { %v720_v40 = vpack.c.bf16 %v137_v33, %v135_v31  ;;  %v157_v29 = vld [vmem:[#allocation2 + $0x318] sm:$0xff]  ;;  %v390_v31 = vld [vmem:[#allocation4 + $0x180] sm:$0xff]  ;;  %v395_v33 = vld [vmem:[#allocation4 + $0x1a8] sm:$0xff] }
  0x5c   :  { %v397_v34 = vld [vmem:[#allocation4 + $0x1b8] sm:$0xff] }
  0x5d   :  { %699 = vmatpush1.bf16.msra.mxu0 %v698_v41  ;;  %v134_v41 = vld [vmem:[#allocation2 + $0x260] sm:$0xff]  ;;  %803 = vmatpush1.bf16.msra.mxu1 %v802_v44  ;;  %v396_v44 = vld [vmem:[#allocation4 + $0x1b0] sm:$0xff] }
  0x5e   :  { %701 = vmatprep.subr.bf16.mxu0 %v700_v45  ;;  %v141_v45 = vld [vmem:[#allocation2 + $0x298] sm:$0xff]  ;;  %v722_v51 = vpack.c.bf16 %v136_v42, %v134_v41  ;;  %805 = vmatprep.subr.bf16.mxu1 %v804_v46  ;;  %v824_v42 = vpack.c.bf16 %v397_v34, %v395_v33  ;;  %v402_v33 = vld [vmem:[#allocation4 + $0x1e0] sm:$0xff]  ;;  %v404_v34 = vld [vmem:[#allocation4 + $0x1f0] sm:$0xff] }
  0x5f   :  { %v724_v52 = vpack.c.bf16 %v141_v45, %v139_v43  ;;  %v161_v41 = vld [vmem:[#allocation2 + $0x338] sm:$0xff]  ;;  %v394_v43 = vld [vmem:[#allocation4 + $0x1a0] sm:$0xff]  ;;  %v399_v45 = vld [vmem:[#allocation4 + $0x1c8] sm:$0xff] }
  0x60   :  { %v401_v46 = vld [vmem:[#allocation4 + $0x1d8] sm:$0xff] }
  0x61   :  { %703 = vmatpush1.bf16.msra.mxu0 %v702_v53  ;;  %v138_v53 = vld [vmem:[#allocation2 + $0x280] sm:$0xff]  ;;  %807 = vmatpush1.bf16.msra.mxu1 %v806_v56 }
  0x62   :  { %705 = vmatprep.subr.bf16.mxu0 %v704_v57  ;;  %v145_v57 = vld [vmem:[#allocation2 + $0x2b8] sm:$0xff]  ;;  %v726_v63 = vpack.c.bf16 %v140_v54, %v138_v53  ;;  %809 = vmatprep.subr.bf16.mxu1 %v808_v58  ;;  %v828_v54 = vpack.c.bf16 %v401_v46, %v399_v45  ;;  %v164_v58 = vld [vmem:[#allocation2 + $0x350] sm:$0xff] }
  0x63   :  { %v728_v0 = vpack.c.bf16 %v145_v57, %v143_v55  ;;  %v165_v53 = vld [vmem:[#allocation2 + $0x358] sm:$0xff]  ;;  %v746_v55 = vpack.c.bf16 %v160_v50, %v158_v49  ;;  %v162_v57 = vld [vmem:[#allocation2 + $0x340] sm:$0xff]  ;;  %v492_v50 = vld [vmem:[%s1129_s5 + $0x8] sm:$0xff] }
  0x64   :  { %v750_v61 = vpack.c.bf16 %v164_v58, %v162_v57  ;;  %v491_v49 = vld [vmem:[%s1129_s5] sm:$0xff]  ;;  %v493_v58 = vld [vmem:[%s1129_s5 + $0x10] sm:$0xff] }
  0x65   :  { %707 = vmatpush1.bf16.msra.mxu0 %v706_v1  ;;  %v142_v1 = vld [vmem:[#allocation2 + $0x2a0] sm:$0xff]  ;;  %811 = vmatpush1.bf16.msra.mxu1 %v810_v4 }
  0x66   :  { %709 = vmatprep.subr.bf16.mxu0 %v708_v3  ;;  %v147_v3 = vld [vmem:[#allocation2 + $0x2c8] sm:$0xff]  ;;  %v730_v11 = vpack.c.bf16 %v144_v2, %v142_v1  ;;  %813 = vmatprep.subr.bf16.mxu1 %v812_v6  ;;  %v173_v2 = vld [vmem:[#allocation2 + $0x398] sm:$0xff]  ;;  %v172_v6 = vld [vmem:[#allocation2 + $0x390] sm:$0xff] }
  0x67   :  { %v732_v12 = vpack.c.bf16 %v149_v5, %v147_v3  ;;  %v171_v1 = vld [vmem:[#allocation2 + $0x388] sm:$0xff]  ;;  %v170_v5 = vld [vmem:[#allocation2 + $0x380] sm:$0xff] }
  0x68   :  { %263 = vmatmul.mubr.f32.vlgmr.msra.gmra.mrb[0].mxu0 %v54_v13  ;;  %v146_v13 = vld [vmem:[#allocation2 + $0x2c0] sm:$0xff]  ;;  %v756_v4 = vpack.c.bf16 %v173_v2, %v171_v1  ;;  %v758_v9 = vpack.c.bf16 %v172_v6, %v170_v5  ;;  %v496_v1 = vld [vmem:[%s1129_s5 + $0x28] sm:$0xff]  ;;  %v513_v2 = vld [vmem:[%s1129_s5 + $0xb0] sm:$0xff] }
  0x69   :  { %711 = vmatpush1.bf16.msra.mxu0 %v710_v14  ;;  %333 = vmatprep.mubr.f32.mxu0 %v57_v19  ;;  %v148_v14 = vld [vmem:[#allocation2 + $0x2d0] sm:$0xff]  ;;  %v386_v19 = vld [vmem:[#allocation4 + $0x160] sm:$0xff] }
  0x6a   :  { %713 = vmatprep.subr.bf16.mxu0 %v712_v16  ;;  %v814_v16 = vpack.c.bf16 %v384_v8, %v382_v7  ;;  %v734_v23 = vpack.c.bf16 %v148_v14, %v146_v13  ;;  %v175_v7 = vld [vmem:[#allocation2 + $0x3a8] sm:$0xff]  ;;  %v177_v8 = vld [vmem:[#allocation2 + $0x3b8] sm:$0xff]  ;;  %v497_v6 = vld [vmem:[%s1129_s5 + $0x30] sm:$0xff] }
  0x6b   :  { %v760_v10 = vpack.c.bf16 %v177_v8, %v175_v7  ;;  %v179_v13 = vld [vmem:[#allocation2 + $0x3c8] sm:$0xff]  ;;  %v181_v14 = vld [vmem:[#allocation2 + $0x3d8] sm:$0xff]  ;;  %v515_v8 = vld [vmem:[%s1129_s5 + $0xc0] sm:$0xff] }
  0x6c   :  { %815 = vmatpush1.bf16.msra.mxu1 %v814_v16  ;;  %v764_v16 = vpack.c.bf16 %v181_v14, %v179_v13  ;;  %v498_v7 = vld [vmem:[%s1129_s5 + $0x38] sm:$0xff]  ;;  %v500_v13 = vld [vmem:[%s1129_s5 + $0x48] sm:$0xff]  ;;  %v517_v14 = vld [vmem:[%s1129_s5 + $0xd0] sm:$0xff] }
  0x6d   :  { %715 = vmatpush1.bf16.msra.mxu0 %v714_v27  ;;  %v155_v27 = vld [vmem:[#allocation2 + $0x308] sm:$0xff]  ;;  %817 = vmatprep.subr.bf16.mxu1 %v816_v18  ;;  %v180_v18 = vld [vmem:[#allocation2 + $0x3d0] sm:$0xff] }
  0x6e   :  { %717 = vmatprep.subr.bf16.mxu0 %v716_v28  ;;  %v818_v28 = vpack.c.bf16 %v388_v20, %v386_v19  ;;  %v740_v36 = vpack.c.bf16 %v157_v29, %v155_v27  ;;  %v183_v19 = vld [vmem:[#allocation2 + $0x3e8] sm:$0xff]  ;;  %v185_v20 = vld [vmem:[#allocation2 + $0x3f8] sm:$0xff]  ;;  %v766_v21 = vpack.c.bf16 %v180_v18, %v178_v17  ;;  %v398_v27 = vld [vmem:[#allocation4 + $0x1c0] sm:$0xff] }
  0x6f   :  { %v768_v22 = vpack.c.bf16 %v185_v20, %v183_v19  ;;  %v501_v18 = vld [vmem:[%s1129_s5 + $0x50] sm:$0xff]  ;;  %v502_v19 = vld [vmem:[%s1129_s5 + $0x58] sm:$0xff]  ;;  %v519_v20 = vld [vmem:[%s1129_s5 + $0xe0] sm:$0xff] }
  0x70   :  { %819 = vmatpush1.bf16.msra.mxu1 %v818_v28  ;;  %v400_v28 = vld [vmem:[#allocation4 + $0x1d0] sm:$0xff] }
  0x71   :  { %719 = vmatpush1.bf16.msra.mxu0 %v718_v39  ;;  %v159_v39 = vld [vmem:[#allocation2 + $0x328] sm:$0xff]  ;;  %821 = vmatprep.subr.bf16.mxu1 %v820_v30  ;;  %v830_v29 = vpack.c.bf16 %v400_v28, %v398_v27  ;;  %v521_v27 = vld [vmem:[%s1129_s5 + $0xf0] sm:$0xff]  ;;  %v522_v28 = vld [vmem:[%s1129_s5 + $0xf8] sm:$0xff] }
  0x72   :  { %721 = vmatprep.subr.bf16.mxu0 %v720_v40  ;;  %v822_v40 = vpack.c.bf16 %v392_v32, %v390_v31  ;;  %v744_v48 = vpack.c.bf16 %v161_v41, %v159_v39  ;;  %v403_v30 = vld [vmem:[#allocation4 + $0x1e8] sm:$0xff]  ;;  %v405_v31 = vld [vmem:[#allocation4 + $0x1f8] sm:$0xff]  ;;  %v188_v39 = vlaneseq }
  0x73   :  { %v832_v32 = vpack.c.bf16 %v405_v31, %v403_v30  ;;  %v505_v30 = vld [vmem:[%s1129_s5 + $0x70] sm:$0xff]  ;;  %v506_v31 = vld [vmem:[%s1129_s5 + $0x78] sm:$0xff] }
  0x74   :  { %823 = vmatpush1.bf16.msra.mxu1 %v822_v40  ;;  %v1010_v40 = vshrl.u32 %v188_v39, 7 }
  0x75   :  { %723 = vmatpush1.bf16.msra.mxu0 %v722_v51  ;;  %v826_v51 = vpack.c.bf16 %v396_v44, %v394_v43  ;;  %825 = vmatprep.subr.bf16.mxu1 %v824_v42  ;;  %v186_v42 = vld [vmem:[%s1126_s2] sm:$0x3] }
  0x76   :  { %725 = vmatprep.subr.bf16.mxu0 %v724_v52  ;;  %v163_v52 = vld [vmem:[#allocation2 + $0x348] sm:$0xff]  ;;  %v190_v41 = vsub.s32 0, %v1010_v40  ;;  %v194_v43 = vsub.s32 1, %v1010_v40 }
  0x77   :  { %v748_v56 = vpack.c.bf16 %v165_v53, %v163_v52  ;;  %v509_v52 = vld [vmem:[%s1129_s5 + $0x90] sm:$0xff]  ;;  %v510_v53 = vld [vmem:[%s1129_s5 + $0x98] sm:$0xff] }
  0x78   :  { %827 = vmatpush1.bf16.msra.mxu1 %v826_v51  ;;  %v191_v44 = vrot.slane %v186_v42, %v190_v41  ;;  %v195_v45 = vrot.slane %v186_v42, %v194_v43  ;;  %v840_v57 = vpack.c.bf16 %v510_v53, %v509_v52 }
  0x79   :  { %727 = vmatpush1.bf16.msra.mxu0 %v726_v63  ;;  %829 = vmatprep.subr.bf16.mxu1 %v828_v54  ;;  %v166_v63 = vld [vmem:[#allocation2 + $0x360] sm:$0xff] }
  0x7a   :  { %729 = vmatprep.subr.bf16.mxu0 %v728_v0  ;;  %v168_v0 = vld [vmem:[#allocation2 + $0x370] sm:$0xff] }
  0x7b   :  { %v754_v3 = vpack.c.bf16 %v168_v0, %v166_v63  ;;  %v495_v0 = vld [vmem:[%s1129_s5 + $0x20] sm:$0xff] }
  0x7c   :  { %831 = vmatpush1.bf16.msra.mxu1 %v830_v29  ;;  %v864_v29 = vpack.c.bf16 %v522_v28, %v521_v27 }
  0x7d   :  { %731 = vmatpush1.bf16.msra.mxu0 %v730_v11  ;;  %v174_v11 = vld [vmem:[#allocation2 + $0x3a0] sm:$0xff]  ;;  %833 = vmatprep.subr.bf16.mxu1 %v832_v32  ;;  %v866_v32 = vpack.c.bf16 %v506_v31, %v505_v30 }
  0x7e   :  { %733 = vmatprep.subr.bf16.mxu0 %v732_v12  ;;  %v176_v12 = vld [vmem:[#allocation2 + $0x3b0] sm:$0xff] }
  0x7f   :  { %v762_v15 = vpack.c.bf16 %v176_v12, %v174_v11  ;;  %v499_v12 = vld [vmem:[%s1129_s5 + $0x40] sm:$0xff] }
  0x81   :  { %735 = vmatpush1.bf16.msra.mxu0 %v734_v23  ;;  %v182_v23 = vld [vmem:[#allocation2 + $0x3e0] sm:$0xff] }
  0x82   :  { %737 = vmatprep.subr.bf16.mxu0 %v736_v24  ;;  %v184_v24 = vld [vmem:[#allocation2 + $0x3f0] sm:$0xff] }
  0x83   :  { %v770_v25 = vpack.c.bf16 %v184_v24, %v182_v23  ;;  %v503_v24 = vld [vmem:[%s1129_s5 + $0x60] sm:$0xff] }
  0x85   :  { %739 = vmatpush1.bf16.msra.mxu0 %v738_v35  ;;  %v834_v35 = vpack.c.bf16 %v404_v34, %v402_v33  ;;  %v406_v33 = vld [vmem:[%s1128_s4] sm:$0x3] }
  0x86   :  { %741 = vmatprep.subr.bf16.mxu0 %v740_v36  ;;  %v507_v36 = vld [vmem:[%s1129_s5 + $0x80] sm:$0xff]  ;;  %v411_v34 = vrot.slane %v406_v33, %v190_v41 }
  0x87   :  { %835 = vmatpush1.bf16.msra.mxu1 %v834_v35  ;;  %v836_v38 = vpack.c.bf16 %v508_v37, %v507_v36  ;;  %v415_v35 = vrot.slane %v406_v33, %v194_v43 }
  0x89   :  { %743 = vmatpush1.bf16.msra.mxu0 %v742_v47  ;;  %837 = vmatprep.subr.bf16.mxu1 %v836_v38 }
  0x8a   :  { %745 = vmatprep.subr.bf16.mxu0 %v744_v48 }
  0x8d   :  { %747 = vmatpush1.bf16.msra.mxu0 %v746_v55  ;;  %v838_v55 = vpack.c.bf16 %v492_v50, %v491_v49 }
  0x8e   :  { %749 = vmatprep.subr.bf16.mxu0 %v748_v56 }
  0x91   :  { %751 = vmatpush1.bf16.msra.mxu0 %v750_v61  ;;  %v512_v61 = vld [vmem:[%s1129_s5 + $0xa8] sm:$0xff] }
  0x92   :  { %753 = vmatprep.subr.bf16.mxu0 %v752_v62  ;;  %v842_v62 = vpack.c.bf16 %v494_v59, %v493_v58  ;;  %v844_v63 = vpack.c.bf16 %v512_v61, %v511_v60 }
  0x95   :  { %755 = vmatpush1.bf16.msra.mxu0 %v754_v3  ;;  %v514_v3 = vld [vmem:[%s1129_s5 + $0xb8] sm:$0xff] }
  0x96   :  { %757 = vmatprep.subr.bf16.mxu0 %v756_v4  ;;  %v846_v4 = vpack.c.bf16 %v496_v1, %v495_v0  ;;  %v848_v5 = vpack.c.bf16 %v514_v3, %v513_v2 }
  0x99   :  { %759 = vmatpush1.bf16.msra.mxu0 %v758_v9  ;;  %v516_v9 = vld [vmem:[%s1129_s5 + $0xc8] sm:$0xff] }
  0x9a   :  { %761 = vmatprep.subr.bf16.mxu0 %v760_v10  ;;  %v850_v10 = vpack.c.bf16 %v498_v7, %v497_v6  ;;  %v852_v11 = vpack.c.bf16 %v516_v9, %v515_v8 }
  0x9d   :  { %763 = vmatpush1.bf16.msra.mxu0 %v762_v15  ;;  %v518_v15 = vld [vmem:[%s1129_s5 + $0xd8] sm:$0xff] }
  0x9e   :  { %765 = vmatprep.subr.bf16.mxu0 %v764_v16  ;;  %v854_v16 = vpack.c.bf16 %v500_v13, %v499_v12  ;;  %v856_v17 = vpack.c.bf16 %v518_v15, %v517_v14 }
  0xa1   :  { %767 = vmatpush1.bf16.msra.mxu0 %v766_v21  ;;  %v520_v21 = vld [vmem:[%s1129_s5 + $0xe8] sm:$0xff] }
  0xa2   :  { %769 = vmatprep.subr.bf16.mxu0 %v768_v22  ;;  %v858_v22 = vpack.c.bf16 %v502_v19, %v501_v18  ;;  %v860_v23 = vpack.c.bf16 %v520_v21, %v519_v20 }
  0xa5   :  { %771 = vmatpush1.bf16.msra.mxu0 %v770_v25  ;;  %v504_v25 = vld [vmem:[%s1129_s5 + $0x68] sm:$0xff] }
  0xa8   :  { %334 = vmatmul.mubr.f32.vlgmr.msra.gmra.mrb[0].mxu0 %v56_v26  ;;  %v862_v26 = vpack.c.bf16 %v504_v25, %v503_v24 }
 0x17b   :  { %v335_v46 = vpop.f32.mrb[0].mxu0 }
 0x17c   :  { %v868_v47 = vadd.f32 %v335_v46, %v191_v44  ;;  %v337_v48 = vpop.f32.mrb[1].mxu0  ;;  %v608_v46 = vld [vmem:[%s1130_s6] ss:$0 sm:$0xff] }
 0x17d   :  { %v869_v51 = vadd.f32 %v337_v48, %v195_v45 }
 0x17e   :  { %v340_v56 = vmax.f32 %v868_v47, 0.0 }
 0x17f   :  { %v341_v54 = vmax.f32 %v869_v51, 0.0 }
 0x181   :  { %482 = vmatprep.mubr.f32.mxu1 %v341_v54 }
 0x182   :  { %483 = vmatmul.mubr.f32.vlgmr.msra.gmra.mrb[0].mxu1 %v340_v56 }
 0x183   :  { %839 = vmatpush3.bf16.msra.mxu1 %v838_v55 }
 0x184   :  { %841 = vmatprep.subr.bf16.mxu1 %v840_v57 }
 0x187   :  { %843 = vmatpush3.bf16.msra.mxu1 %v842_v62 }
 0x188   :  { %845 = vmatprep.subr.bf16.mxu1 %v844_v63 }
 0x18b   :  { %847 = vmatpush3.bf16.msra.mxu1 %v846_v4 }
 0x18c   :  { %849 = vmatprep.subr.bf16.mxu1 %v848_v5 }
 0x18f   :  { %851 = vmatpush3.bf16.msra.mxu1 %v850_v10 }
 0x190   :  { %853 = vmatprep.subr.bf16.mxu1 %v852_v11 }
 0x193   :  { %855 = vmatpush3.bf16.msra.mxu1 %v854_v16 }
 0x194   :  { %857 = vmatprep.subr.bf16.mxu1 %v856_v17 }
 0x197   :  { %859 = vmatpush3.bf16.msra.mxu1 %v858_v22 }
 0x198   :  { %861 = vmatprep.subr.bf16.mxu1 %v860_v23 }
 0x19b   :  { %863 = vmatpush3.bf16.msra.mxu1 %v862_v26 }
 0x19c   :  { %865 = vmatprep.subr.bf16.mxu1 %v864_v29 }
 0x19f   :  { %867 = vmatpush3.bf16.msra.mxu1 %v866_v32 }
 0x255   :  { %v484_v36 = vpop.f32.mrb[0].mxu1 }
 0x256   :  { %v485_v37 = vadd.f32 %v484_v36, %v411_v34  ;;  %v486_v38 = vpop.f32.mrb[1].mxu1 }
 0x257   :  { %v487_v39 = vadd.f32 %v486_v38, %v415_v35 }
 0x258   :  { %v489_v44 = vmax.f32 %v485_v37, 0.0 }
 0x259   :  { %v490_v42 = vmax.f32 %v487_v39, 0.0 }
 0x25b   :  { %594 = vmatprep.mubr.f32.mxu1 %v490_v42 }
 0x25c   :  { %595 = vmatmul.mubr.f32.vlgmr.msra.gmra.mrb[2].mxu1 %v489_v44 }
 0x32f   :  { %v641_v45 = vpop.f32.mrb[2].mxu1 }
 0x330   :  { %v642_v47 = vpop.f32.mrb[3].mxu1 }
 0x331   :  { %v643_v48 = vadd.f32 %v642_v47, %v641_v45 }
 0x333   :  { %v597_v41 = vadd.f32 %v643_v48, %v608_v46 }
 0x335   :  { %601 = vst.msk [vmem:[%s1131_s7] sm:$0xff] %vm600_vm0, %v597_v41 }
 0x336   :  { %606 = vsyncpa [#allocation3], 1 }
 0x337   :  { %607 = vsyncpa [#allocation5], 1 }

</bundles_post_ra>
